<compile_context>
chip_gen: v6e
topology: v6e:2x2x1
jax: 0.10.0
libtpu: 0.0.40
codegen_flags: <defaults>
</compile_context>

<pallas_src>
import functools
import math

import jax
import jax.numpy as jnp
from jax.experimental import pallas as pl
from jax.experimental.pallas import tpu as pltpu

LANE = 128  # lane-padded width for all hidden / output dims


def _round_up(n, m):
    return ((n + m - 1) // m) * m


# ---------------- Pallas kernel: fused embedding + classifier MLP ------------
def _mlp_kernel(x_ref, w1_ref, w2_ref, w3_ref, w4_ref, vec_ref, out_ref):
    P = LANE
    # Packed per-feature vectors (f32), static lane-dense slices.
    b1 = vec_ref[:, pl.ds(0 * P, P)]
    s1 = vec_ref[:, pl.ds(1 * P, P)]
    t1 = vec_ref[:, pl.ds(2 * P, P)]
    b2 = vec_ref[:, pl.ds(3 * P, P)]
    b3 = vec_ref[:, pl.ds(4 * P, P)]
    b4 = vec_ref[:, pl.ds(5 * P, P)]

    # x arrives in f32 (no wrapper-side cast pass); cast to bf16 in-kernel.
    x = x_ref[...].astype(jnp.bfloat16)                 # (TILE_B, IN_pad)

    # Embedding: Flatten -> Linear -> ReLU   (pre-BN activation)
    h1 = jnp.dot(x, w1_ref[...], preferred_element_type=jnp.float32) + b1
    h1 = jnp.maximum(h1, 0.0)
    # BatchNorm1d (eval) applied only for the embedding output; for the
    # classifier it is folded into W2'/b2'.
    emb = h1 * s1 + t1

    # Classifier hidden layer 1: Linear (BN1 folded in) -> ReLU
    h1b = h1.astype(jnp.bfloat16)
    h2 = jnp.dot(h1b, w2_ref[...], preferred_element_type=jnp.float32) + b2
    h2 = jnp.maximum(h2, 0.0).astype(jnp.bfloat16)

    # Classifier hidden layer 2: Linear (BN2 folded in) -> ReLU
    h3 = jnp.dot(h2, w3_ref[...], preferred_element_type=jnp.float32) + b3
    h3 = jnp.maximum(h3, 0.0).astype(jnp.bfloat16)

    # Final classification layer (BN3 folded in, no activation)
    pred = jnp.dot(h3, w4_ref[...], preferred_element_type=jnp.float32) + b4

    # Single lane-dense bf16 output slab: [pred | emb], both 128-lane aligned.
    out_ref[:, pl.ds(0, P)] = pred.astype(jnp.bfloat16)
    out_ref[:, pl.ds(P, P)] = emb.astype(jnp.bfloat16)


def _choose_tiling(B):
    """Pick (padded_batch, batch_tile)."""
    if B <= 128:
        Bp = _round_up(max(B, 8), 8)
        return Bp, Bp
    # Large batch: big tiles to amortize per-step overhead and fill the
    # 256-row MXU, but force >= 2 grid steps so both TCs are used on v7x.
    big = 1024
    half = _round_up((B + 1) // 2, 128)
    tile_b = min(big, half)
    Bp = _round_up(B, tile_b)
    return Bp, tile_b


@functools.partial(jax.jit, static_argnames=("feature_size", "num_classes"))
def base_model_forward(x_nchw, params, *, feature_size, num_classes):
    """BaseModel forward (return_features=True): returns (predictions, embedding)."""
    w1, w2, w3, w4, vec = params

    B = x_nchw.shape[0]
    x_flat = x_nchw.reshape(B, -1)                     # nn.Flatten (glue), stays f32
    in_features = x_flat.shape[1]
    in_pad = w1.shape[0]                               # lane-padded K

    Bp, tile_b = _choose_tiling(B)

    pad_r, pad_c = Bp - B, in_pad - in_features
    if pad_r or pad_c:
        x_flat = jnp.pad(x_flat, ((0, pad_r), (0, pad_c)))

    grid = (Bp // tile_b,)
    full = lambda i: (0, 0)   # weights / packed vec stay resident across grid

    out = pl.pallas_call(
        _mlp_kernel,
        out_shape=jax.ShapeDtypeStruct((Bp, 2 * LANE), jnp.bfloat16),
        grid=grid,
        in_specs=[
            pl.BlockSpec((tile_b, in_pad), lambda i: (i, 0)),     # x (f32)
            pl.BlockSpec((in_pad, LANE), full),                   # W1 (bf16)
            pl.BlockSpec((LANE, LANE), full),                     # W2' (bf16)
            pl.BlockSpec((LANE, LANE), full),                     # W3' (bf16)
            pl.BlockSpec((LANE, LANE), full),                     # W4' (bf16)
            pl.BlockSpec((1, 6 * LANE), full),                    # packed vectors (f32)
        ],
        out_specs=pl.BlockSpec((tile_b, 2 * LANE), lambda i: (i, 0)),
        compiler_params=pltpu.CompilerParams(
            dimension_semantics=("parallel",)),
    )(x_flat, w1, w2, w3, w4, vec)

    preds = out[:B, :num_classes].astype(jnp.float32)
    emb = out[:B, LANE:LANE + feature_size].astype(jnp.float32)
    return preds, emb


# ---------------- deterministic parameter construction -----------------------
def build_params(key, in_features, feature_size, hidden_sizes, num_classes,
                 bn_eps=1e-5):
    """Builds folded, lane-padded, bf16 parameters for the fused kernel."""
    assert len(hidden_sizes) == 2, "fused kernel is specialized to 2 hidden layers"
    dims = [in_features, feature_size] + list(hidden_sizes) + [num_classes]
    assert all(d <= LANE for d in dims[1:]), "hidden/output widths must be <= 128"
    keys = jax.random.split(key, len(dims) - 1)

    ws, bs, scales, shifts = [], [], [], []
    for li in range(len(dims) - 1):
        fi, fo = dims[li], dims[li + 1]
        # nn.init.kaiming_normal_(mode='fan_out', nonlinearity='relu'): std=sqrt(2/fan_out)
        std = math.sqrt(2.0 / fo)
        ws.append(jax.random.normal(keys[li], (fi, fo), dtype=jnp.float32) * std)
        bs.append(jnp.zeros((fo,), jnp.float32))                  # bias init 0
        if li < len(dims) - 2:
            # BatchNorm1d eval mode: gamma=1, beta=0, running_mean=0, running_var=1
            gamma = jnp.ones((fo,), jnp.float32)
            beta = jnp.zeros((fo,), jnp.float32)
            rmean = jnp.zeros((fo,), jnp.float32)
            rvar = jnp.ones((fo,), jnp.float32)
            scale = gamma / jnp.sqrt(rvar + bn_eps)
            shift = beta - rmean * scale
            scales.append(scale)
            shifts.append(shift)

    # Fold BN_i (applied after ReLU of layer i) into layer i+1:
    #   (relu*s + t) @ W + b == relu @ (diag(s) @ W) + (t @ W + b)
    # s1/t1 are also kept unfolded for the embedding output itself.
    for i in range(1, len(ws)):
        s, t = scales[i - 1], shifts[i - 1]
        bs[i] = t @ ws[i] + bs[i]
        ws[i] = ws[i] * s[:, None]

    # Lane-dense zero padding + bf16 cast for the matmul operands.
    in_pad = _round_up(in_features, LANE)
    padded_in = [in_pad] + [LANE] * (len(ws) - 1)
    w_bf16 = []
    for i, w in enumerate(ws):
        fi, fo = w.shape
        wp = jnp.zeros((padded_in[i], LANE), jnp.float32).at[:fi, :fo].set(w)
        w_bf16.append(wp.astype(jnp.bfloat16))

    def pad_vec(v):
        return jnp.zeros((LANE,), jnp.float32).at[:v.shape[0]].set(v)

    # One packed (1, 6*128) f32 array: b1, s1, t1, b2', b3', b4'.
    vec = jnp.concatenate([
        pad_vec(bs[0]), pad_vec(scales[0]), pad_vec(shifts[0]),
        pad_vec(bs[1]), pad_vec(bs[2]), pad_vec(bs[3]),
    ])[None, :]

    # f32 (unfolded) copies for the pure-JAX reference.
    ref_params = (ws, bs, scales, shifts)
    return (w_bf16[0], w_bf16[1], w_bf16[2], w_bf16[3], vec), ref_params


def _reference_forward(x_nchw, ref_params):
    """Pure-JAX f32 reference (BN already folded into W2..W4 in ref_params)."""
    ws, bs, scales, shifts = ref_params
    x = x_nchw.reshape(x_nchw.shape[0], -1)
    h1 = jnp.maximum(x @ ws[0] + bs[0], 0.0)
    emb = h1 * scales[0] + shifts[0]
    h2 = jnp.maximum(h1 @ ws[1] + bs[1], 0.0)
    h3 = jnp.maximum(h2 @ ws[2] + bs[2], 0.0)
    pred = h3 @ ws[3] + bs[3]
    return pred, emb


# ---------------------------------- main -------------------------------------
if __name__ == "__main__":
    # ModelConfig(input_size=(4,16,16), feature_size=32, num_classes=10,
    #             hidden_sizes=[64, 32], dropout=0.0, batch_norm=True)
    B, C, H, W = 2, 4, 16, 16
    feature_size = 32
    hidden_sizes = [64, 32]
    num_classes = 10

    key = jax.random.PRNGKey(0)
    kx, kp = jax.random.split(key)

    x = jax.random.normal(kx, (B, C, H, W), dtype=jnp.float32)
    params, ref_params = build_params(
        kp, C * H * W, feature_size, hidden_sizes, num_classes)

    preds, emb = base_model_forward(
        x, params, feature_size=feature_size, num_classes=num_classes)
    jax.block_until_ready((preds, emb))

    assert preds.shape == (B, num_classes), preds.shape
    assert emb.shape == (B, feature_size), emb.shape
    assert bool(jnp.all(jnp.isfinite(preds))) and bool(jnp.all(jnp.isfinite(emb)))

    # Loose-tolerance check vs f32 reference (bf16 operands / bf16 output slab).
    ref_pred, ref_emb = _reference_forward(x, ref_params)
    assert bool(jnp.all(jnp.abs(preds - ref_pred) <= 0.5 + 0.1 * jnp.abs(ref_pred)))
    assert bool(jnp.all(jnp.abs(emb - ref_emb) <= 0.5 + 0.1 * jnp.abs(ref_emb)))

    print("KERNEL_OK")
</pallas_src>

<mosaic_0001>
module attributes {stable_mosaic.version = 11 : i64} {
  func.func @_mlp_kernel(%arg0: i32, %arg1: memref<8x1024xf32, #tpu.memory_space<vmem>>, %arg2: memref<1024x128xbf16, #tpu.memory_space<vmem>>, %arg3: memref<128x128xbf16, #tpu.memory_space<vmem>>, %arg4: memref<128x128xbf16, #tpu.memory_space<vmem>>, %arg5: memref<128x128xbf16, #tpu.memory_space<vmem>>, %arg6: memref<1x768xf32, #tpu.memory_space<vmem>>, %arg7: memref<8x256xbf16, #tpu.memory_space<vmem>>) attributes {dimension_semantics = [#tpu.dimension_semantics<parallel>], iteration_bounds = array<i64: 1>, scalar_prefetch = 0 : i64, scratch_operands = 0 : i64, tpu.core_type = #tpu.core_type<tc>, window_params = [{transform_indices = @transform_0, window_bounds = array<i64: 8, 1024>}, {pipeline_mode = #tpu.pipeline_mode<synchronous>, transform_indices = @transform_1, window_bounds = array<i64: 1024, 128>}, {pipeline_mode = #tpu.pipeline_mode<synchronous>, transform_indices = @transform_2, window_bounds = array<i64: 128, 128>}, {pipeline_mode = #tpu.pipeline_mode<synchronous>, transform_indices = @transform_3, window_bounds = array<i64: 128, 128>}, {pipeline_mode = #tpu.pipeline_mode<synchronous>, transform_indices = @transform_4, window_bounds = array<i64: 128, 128>}, {pipeline_mode = #tpu.pipeline_mode<synchronous>, transform_indices = @transform_5, window_bounds = array<i64: 1, 768>}, {transform_indices = @transform_6, window_bounds = array<i64: 8, 256>}]} {
    %c0 = arith.constant 0 : index
    %c0_0 = arith.constant 0 : index
    %0 = vector.load %arg6[%c0, %c0_0] : memref<1x768xf32, #tpu.memory_space<vmem>>, vector<1x128xf32>
    %c0_1 = arith.constant 0 : index
    %c128 = arith.constant 128 : index
    %1 = vector.load %arg6[%c0_1, %c128] : memref<1x768xf32, #tpu.memory_space<vmem>>, vector<1x128xf32>
    %c0_2 = arith.constant 0 : index
    %c256 = arith.constant 256 : index
    %2 = vector.load %arg6[%c0_2, %c256] : memref<1x768xf32, #tpu.memory_space<vmem>>, vector<1x128xf32>
    %c0_3 = arith.constant 0 : index
    %c384 = arith.constant 384 : index
    %3 = vector.load %arg6[%c0_3, %c384] : memref<1x768xf32, #tpu.memory_space<vmem>>, vector<1x128xf32>
    %c0_4 = arith.constant 0 : index
    %c512 = arith.constant 512 : index
    %4 = vector.load %arg6[%c0_4, %c512] : memref<1x768xf32, #tpu.memory_space<vmem>>, vector<1x128xf32>
    %c0_5 = arith.constant 0 : index
    %c640 = arith.constant 640 : index
    %5 = vector.load %arg6[%c0_5, %c640] : memref<1x768xf32, #tpu.memory_space<vmem>>, vector<1x128xf32>
    %c0_6 = arith.constant 0 : index
    %c0_7 = arith.constant 0 : index
    %6 = vector.load %arg1[%c0_6, %c0_7] : memref<8x1024xf32, #tpu.memory_space<vmem>>, vector<8x1024xf32>
    %7 = arith.truncf %6 : vector<8x1024xf32> to vector<8x1024xbf16>
    %c0_8 = arith.constant 0 : index
    %c0_9 = arith.constant 0 : index
    %8 = vector.load %arg2[%c0_8, %c0_9] : memref<1024x128xbf16, #tpu.memory_space<vmem>>, vector<1024x128xbf16>
    %cst = arith.constant dense<0.000000e+00> : vector<8x128xf32>
    %9 = tpu.matmul %7, %8, %cst {dimension_numbers = #tpu.dot_dimension_numbers<[1], [0], [0], [1], [0, 0, 1, 1], [], []>} : vector<8x1024xbf16>, vector<1024x128xbf16>, vector<8x128xf32> -> vector<8x128xf32>
    %10 = vector.broadcast %0 : vector<1x128xf32> to vector<8x128xf32>
    %11 = arith.addf %9, %10 : vector<8x128xf32>
    %cst_10 = arith.constant 0.000000e+00 : f32
    %12 = vector.broadcast %cst_10 : f32 to vector<8x128xf32>
    %13 = arith.maximumf %11, %12 : vector<8x128xf32>
    %14 = vector.broadcast %1 : vector<1x128xf32> to vector<8x128xf32>
    %15 = arith.mulf %13, %14 : vector<8x128xf32>
    %16 = vector.broadcast %2 : vector<1x128xf32> to vector<8x128xf32>
    %17 = arith.addf %15, %16 : vector<8x128xf32>
    %18 = arith.truncf %13 : vector<8x128xf32> to vector<8x128xbf16>
    %c0_11 = arith.constant 0 : index
    %c0_12 = arith.constant 0 : index
    %19 = vector.load %arg3[%c0_11, %c0_12] : memref<128x128xbf16, #tpu.memory_space<vmem>>, vector<128x128xbf16>
    %cst_13 = arith.constant dense<0.000000e+00> : vector<8x128xf32>
    %20 = tpu.matmul %18, %19, %cst_13 {dimension_numbers = #tpu.dot_dimension_numbers<[1], [0], [0], [1], [0, 0, 1, 1], [], []>} : vector<8x128xbf16>, vector<128x128xbf16>, vector<8x128xf32> -> vector<8x128xf32>
    %21 = vector.broadcast %3 : vector<1x128xf32> to vector<8x128xf32>
    %22 = arith.addf %20, %21 : vector<8x128xf32>
    %cst_14 = arith.constant 0.000000e+00 : f32
    %23 = vector.broadcast %cst_14 : f32 to vector<8x128xf32>
    %24 = arith.maximumf %22, %23 : vector<8x128xf32>
    %25 = arith.truncf %24 : vector<8x128xf32> to vector<8x128xbf16>
    %c0_15 = arith.constant 0 : index
    %c0_16 = arith.constant 0 : index
    %26 = vector.load %arg4[%c0_15, %c0_16] : memref<128x128xbf16, #tpu.memory_space<vmem>>, vector<128x128xbf16>
    %cst_17 = arith.constant dense<0.000000e+00> : vector<8x128xf32>
    %27 = tpu.matmul %25, %26, %cst_17 {dimension_numbers = #tpu.dot_dimension_numbers<[1], [0], [0], [1], [0, 0, 1, 1], [], []>} : vector<8x128xbf16>, vector<128x128xbf16>, vector<8x128xf32> -> vector<8x128xf32>
    %28 = vector.broadcast %4 : vector<1x128xf32> to vector<8x128xf32>
    %29 = arith.addf %27, %28 : vector<8x128xf32>
    %cst_18 = arith.constant 0.000000e+00 : f32
    %30 = vector.broadcast %cst_18 : f32 to vector<8x128xf32>
    %31 = arith.maximumf %29, %30 : vector<8x128xf32>
    %32 = arith.truncf %31 : vector<8x128xf32> to vector<8x128xbf16>
    %c0_19 = arith.constant 0 : index
    %c0_20 = arith.constant 0 : index
    %33 = vector.load %arg5[%c0_19, %c0_20] : memref<128x128xbf16, #tpu.memory_space<vmem>>, vector<128x128xbf16>
    %cst_21 = arith.constant dense<0.000000e+00> : vector<8x128xf32>
    %34 = tpu.matmul %32, %33, %cst_21 {dimension_numbers = #tpu.dot_dimension_numbers<[1], [0], [0], [1], [0, 0, 1, 1], [], []>} : vector<8x128xbf16>, vector<128x128xbf16>, vector<8x128xf32> -> vector<8x128xf32>
    %35 = vector.broadcast %5 : vector<1x128xf32> to vector<8x128xf32>
    %36 = arith.addf %34, %35 : vector<8x128xf32>
    %37 = arith.truncf %36 : vector<8x128xf32> to vector<8x128xbf16>
    %c0_22 = arith.constant 0 : index
    %c0_23 = arith.constant 0 : index
    %38 = vector.load %arg7[%c0_22, %c0_23] : memref<8x256xbf16, #tpu.memory_space<vmem>>, vector<8x128xbf16>
    tpu.vector_store %arg7[%c0_22, %c0_23], %37 {strides = array<i32>} : memref<8x256xbf16, #tpu.memory_space<vmem>>, vector<8x128xbf16>,
    %39 = arith.truncf %17 : vector<8x128xf32> to vector<8x128xbf16>
    %c0_24 = arith.constant 0 : index
    %c128_25 = arith.constant 128 : index
    %40 = vector.load %arg7[%c0_24, %c128_25] : memref<8x256xbf16, #tpu.memory_space<vmem>>, vector<8x128xbf16>
    tpu.vector_store %arg7[%c0_24, %c128_25], %39 {strides = array<i32>} : memref<8x256xbf16, #tpu.memory_space<vmem>>, vector<8x128xbf16>,
    return
  }
  func.func @transform_0(%arg0: i32) -> (i32, i32) {
    %c0_i32 = arith.constant 0 : i32
    %c0_i32_0 = arith.constant 0 : i32
    return %arg0, %c0_i32 : i32, i32
  }
  func.func @transform_1(%arg0: i32) -> (i32, i32) {
    %c0_i32 = arith.constant 0 : i32
    %c0_i32_0 = arith.constant 0 : i32
    %c0_i32_1 = arith.constant 0 : i32
    return %c0_i32, %c0_i32_0 : i32, i32
  }
  func.func @transform_2(%arg0: i32) -> (i32, i32) {
    %c0_i32 = arith.constant 0 : i32
    %c0_i32_0 = arith.constant 0 : i32
    %c0_i32_1 = arith.constant 0 : i32
    return %c0_i32, %c0_i32_0 : i32, i32
  }
  func.func @transform_3(%arg0: i32) -> (i32, i32) {
    %c0_i32 = arith.constant 0 : i32
    %c0_i32_0 = arith.constant 0 : i32
    %c0_i32_1 = arith.constant 0 : i32
    return %c0_i32, %c0_i32_0 : i32, i32
  }
  func.func @transform_4(%arg0: i32) -> (i32, i32) {
    %c0_i32 = arith.constant 0 : i32
    %c0_i32_0 = arith.constant 0 : i32
    %c0_i32_1 = arith.constant 0 : i32
    return %c0_i32, %c0_i32_0 : i32, i32
  }
  func.func @transform_5(%arg0: i32) -> (i32, i32) {
    %c0_i32 = arith.constant 0 : i32
    %c0_i32_0 = arith.constant 0 : i32
    %c0_i32_1 = arith.constant 0 : i32
    return %c0_i32, %c0_i32_0 : i32, i32
  }
  func.func @transform_6(%arg0: i32) -> (i32, i32) {
    %c0_i32 = arith.constant 0 : i32
    %c0_i32_0 = arith.constant 0 : i32
    return %arg0, %c0_i32 : i32, i32
  }
}

</mosaic_0001>

<bundles_post_ra>
// kernel: base_model_forward.1
= control target key start
LH: loop header
LB: loop body
LE: loop exit
PB: predicated region body
PF: predicated region fallthrough
CT: control target
= control target key end

     0   :  { %11 = vsyncpa [#allocation3], 0  ;;  %s1486_s21 = smov [#allocation2]   ;;  %s1676_s0 = inlined_call_operand.vmem [shape: f32[8,1024], index: 0, kind: input, shape index: {}]   ;;  %s1677_s1 = inlined_call_operand.hbm [shape: bf16[1024,128], index: 1, kind: input, shape index: {}]   ;;  %s1678_s2 = inlined_call_operand.vmem [shape: bf16[128,128], index: 2, kind: input, shape index: {}]   ;;  %s1679_s3 = inlined_call_operand.vmem [shape: bf16[128,128], index: 3, kind: input, shape index: {}]   ;;  %s1680_s4 = inlined_call_operand.vmem [shape: bf16[128,128], index: 4, kind: input, shape index: {}]   ;;  %s1681_s5 = inlined_call_operand.vmem [shape: f32[1,768], index: 5, kind: input, shape index: {}]   ;;  %s1682_s6 = inlined_call_operand.vmem [shape: bf16[8,256], index: 6, kind: output, shape index: {}]  }
   0x1   :  { %s19_s22 = sshll.u32 %s1486_s21, 4  ;;  %s20_s22 = int_to_ptr.vmem [resolvable:$true] %s19_s22 }
   0x2   :  { %s1472_s23 = scalar_lea.vmem %s20_s22, 8192  ;;  %p1477_p1 = scmp.lt.s32.totalorder %s20_s22, %s20_s22 }
   0x3   :  { %p1473_p0 = scmp.ne.s32.totalorder %s20_s22, %s1472_s23  ;;  %p1478_p2 = scmp.lt.s32.totalorder %s1472_s23, %s1472_s23 }
   0x5   :  { %p1479_p3 = por %p1478_p2, %p1477_p1 }
   0x7   :  { %p1480_p4 = pnand %p1479_p3, %p1473_p0 }
   0x9   :  { %1483 = shalt.err (!%p1480_p4)
}
   0xa   :  { %s1487_s24 = smov 64   ;;  %s1488_s25 = smov 4  }
   0xb   :  { %25 = dma.hbm_to_vmem [thread:$0]  %s1677_s1, 8192, %s20_s22, [#allocation3], %s1487_s24, %s1487_s24, %s1488_s25  }
   0xc   :  { %1484 = dma.done.wait [#allocation3], 8192  }
   0xd   :  { %1485 = vsyncadd [#allocation3], 4294959104  ;;  %v1376_v0 = vld [vmem:[#allocation2 + $0x78] sm:$0xff]   ;;  %v1380_v4 = vld [vmem:[#allocation2 + $0x70] sm:$0xff]   ;;  %vm1490_vm0 = vmmov 0  }
   0xe   :  { %v1377_v1 = vld [vmem:[#allocation2 + $0xf8] sm:$0xff]   ;;  %1196 = vmatprep.subr.bf16.mxu0 %v1376_v0  ;;  %v1381_v5 = vld [vmem:[#allocation2 + $0xf0] sm:$0xff]   ;;  %v1384_v8 = vld [vmem:[#allocation2 + $0x68] sm:$0xff]  }
   0xf   :  { %v1378_v2 = vld [vmem:[#allocation2 + $0x38] sm:$0xff]   ;;  %1218 = vmatprep.subr.bf16.mxu1 %v1377_v1  ;;  %v1382_v6 = vld [vmem:[#allocation2 + $0x30] sm:$0xff]   ;;  %v1385_v9 = vld [vmem:[#allocation2 + $0xe8] sm:$0xff]  }
  0x10   :  { %v1379_v3 = vld [vmem:[#allocation2 + $0xb8] sm:$0xff]   ;;  %1197 = vmatpush3.bf16.msra.mxu0 %v1378_v2  ;;  %v1383_v7 = vld [vmem:[#allocation2 + $0xb0] sm:$0xff]   ;;  %v1386_v10 = vld [vmem:[#allocation2 + $0x28] sm:$0xff]  }
  0x11   :  { %1219 = vmatpush3.bf16.msra.mxu1 %v1379_v3  ;;  %1198 = vmatprep.subr.bf16.mxu0 %v1380_v4  ;;  %v1387_v11 = vld [vmem:[#allocation2 + $0xa8] sm:$0xff]   ;;  %v1388_v12 = vld [vmem:[#allocation2 + $0x60] sm:$0xff]   ;;  %v1392_v16 = vld [vmem:[#allocation2 + $0x58] sm:$0xff]  }
  0x12   :  { %1220 = vmatprep.subr.bf16.mxu1 %v1381_v5  ;;  %v1389_v13 = vld [vmem:[#allocation2 + $0xe0] sm:$0xff]   ;;  %v1393_v17 = vld [vmem:[#allocation2 + $0xd8] sm:$0xff]   ;;  %v1396_v20 = vld [vmem:[#allocation2 + $0x50] sm:$0xff]  }
  0x13   :  { %v1390_v14 = vld [vmem:[#allocation2 + $0x20] sm:$0xff]   ;;  %v1394_v18 = vld [vmem:[#allocation2 + $0x18] sm:$0xff]   ;;  %v1397_v21 = vld [vmem:[#allocation2 + $0xd0] sm:$0xff]  }
  0x14   :  { %1199 = vmatpush3.bf16.msra.mxu0 %v1382_v6  ;;  %v1391_v15 = vld [vmem:[#allocation2 + $0xa0] sm:$0xff]   ;;  %v1395_v19 = vld [vmem:[#allocation2 + $0x98] sm:$0xff]   ;;  %v1398_v22 = vld [vmem:[#allocation2 + $0x10] sm:$0xff]  }
  0x15   :  { %1221 = vmatpush3.bf16.msra.mxu1 %v1383_v7  ;;  %1200 = vmatprep.subr.bf16.mxu0 %v1384_v8  ;;  %v1399_v23 = vld [vmem:[#allocation2 + $0x90] sm:$0xff]   ;;  %v1400_v24 = vld [vmem:[#allocation2 + $0x48] sm:$0xff]   ;;  %v1404_v28 = vld [vmem:[#allocation2 + $0x40] sm:$0xff]  }
  0x16   :  { %1222 = vmatprep.subr.bf16.mxu1 %v1385_v9  ;;  %v1401_v25 = vld [vmem:[#allocation2 + $0xc8] sm:$0xff]   ;;  %v1405_v29 = vld [vmem:[#allocation2 + $0xc0] sm:$0xff]   ;;  %v47_v33 = vld [vmem:[%s1676_s0 + $0x18] sm:$0xff] }
  0x17   :  { %v1402_v26 = vld [vmem:[#allocation2 + $0x8] sm:$0xff]   ;;  %v1406_v30 = vld [vmem:[#allocation2] sm:$0xff]   ;;  %v55_v36 = vpack.c.bf16 %v47_v33, %v47_v33  ;;  %v46_v38 = vld [vmem:[%s1676_s0 + $0x10] sm:$0xff] }
  0x18   :  { %1201 = vmatpush3.bf16.msra.mxu0 %v1386_v10  ;;  %v1403_v27 = vld [vmem:[#allocation2 + $0x88] sm:$0xff]   ;;  %v1407_v31 = vld [vmem:[#allocation2 + $0x80] sm:$0xff]   ;;  %v54_v39 = vpack.c.bf16 %v46_v38, %v46_v38  ;;  %v1408_v40 = vld [vmem:[#allocation2 + $0x178] sm:$0xff]  }
  0x19   :  { %1223 = vmatpush3.bf16.msra.mxu1 %v1387_v11  ;;  %1202 = vmatprep.subr.bf16.mxu0 %v1388_v12  ;;  %v45_v32 = vld [vmem:[%s1676_s0 + $0x8] sm:$0xff]  ;;  %v44_v34 = vld [vmem:[%s1676_s0] sm:$0xff]  ;;  %v1409_v41 = vld [vmem:[#allocation2 + $0x1f8] sm:$0xff]  }
  0x1a   :  { %1224 = vmatprep.subr.bf16.mxu1 %v1389_v13  ;;  %v53_v35 = vpack.c.bf16 %v45_v32, %v45_v32  ;;  %v52_v37 = vpack.c.bf16 %v44_v34, %v44_v34  ;;  %650 = vmatprep.mubr.bf16.mxu1 %v55_v36  ;;  %v1410_v42 = vld [vmem:[#allocation2 + $0x138] sm:$0xff]   ;;  %v1412_v44 = vld [vmem:[#allocation2 + $0x170] sm:$0xff]   ;;  %v1416_v48 = vld [vmem:[#allocation2 + $0x168] sm:$0xff]  }
  0x1b   :  { %v1411_v43 = vld [vmem:[#allocation2 + $0x1b8] sm:$0xff]   ;;  %v1413_v45 = vld [vmem:[#allocation2 + $0x1f0] sm:$0xff]   ;;  %v1417_v49 = vld [vmem:[#allocation2 + $0x1e8] sm:$0xff]  }
  0x1c   :  { %1203 = vmatpush3.bf16.msra.mxu0 %v1390_v14  ;;  %610 = vmatprep.mubr.bf16.mxu0 %v53_v35  ;;  %v1414_v46 = vld [vmem:[#allocation2 + $0x130] sm:$0xff]   ;;  %v1418_v50 = vld [vmem:[#allocation2 + $0x128] sm:$0xff]   ;;  %v1420_v52 = vld [vmem:[#allocation2 + $0x160] sm:$0xff]  }
  0x1d   :  { %1225 = vmatpush3.bf16.msra.mxu1 %v1391_v15  ;;  %1204 = vmatprep.subr.bf16.mxu0 %v1392_v16  ;;  %v1415_v47 = vld [vmem:[#allocation2 + $0x1b0] sm:$0xff]   ;;  %v1419_v51 = vld [vmem:[#allocation2 + $0x1a8] sm:$0xff]   ;;  %v1421_v53 = vld [vmem:[#allocation2 + $0x1e0] sm:$0xff]  }
  0x1e   :  { %1226 = vmatprep.subr.bf16.mxu1 %v1393_v17  ;;  %v1422_v54 = vld [vmem:[#allocation2 + $0x120] sm:$0xff]   ;;  %v1424_v56 = vld [vmem:[#allocation2 + $0x158] sm:$0xff]   ;;  %v1428_v60 = vld [vmem:[#allocation2 + $0x150] sm:$0xff]   ;;  %v1489_v17 = vmov 0.0  }
  0x1f   :  { %v1423_v55 = vld [vmem:[#allocation2 + $0x1a0] sm:$0xff]   ;;  %v1425_v57 = vld [vmem:[#allocation2 + $0x1d8] sm:$0xff]   ;;  %v1429_v61 = vld [vmem:[#allocation2 + $0x1d0] sm:$0xff]  }
  0x20   :  { %1205 = vmatpush3.bf16.msra.mxu0 %v1394_v18  ;;  %v1426_v58 = vld [vmem:[#allocation2 + $0x118] sm:$0xff]   ;;  %v1430_v62 = vld [vmem:[#allocation2 + $0x110] sm:$0xff]   ;;  %v1432_v0 = vld [vmem:[#allocation2 + $0x148] sm:$0xff]  }
  0x21   :  { %1227 = vmatpush3.bf16.msra.mxu1 %v1395_v19  ;;  %1206 = vmatprep.subr.bf16.mxu0 %v1396_v20  ;;  %v1427_v59 = vld [vmem:[#allocation2 + $0x198] sm:$0xff]   ;;  %v1431_v63 = vld [vmem:[#allocation2 + $0x190] sm:$0xff]   ;;  %v1433_v1 = vld [vmem:[#allocation2 + $0x1c8] sm:$0xff]  }
  0x22   :  { %1228 = vmatprep.subr.bf16.mxu1 %v1397_v21  ;;  %v1434_v2 = vld [vmem:[#allocation2 + $0x108] sm:$0xff]   ;;  %v1436_v4 = vld [vmem:[#allocation2 + $0x140] sm:$0xff]   ;;  %v51_v9 = vld [vmem:[%s1676_s0 + $0x38] sm:$0xff] }
  0x23   :  { %v1435_v3 = vld [vmem:[#allocation2 + $0x188] sm:$0xff]   ;;  %v1437_v5 = vld [vmem:[#allocation2 + $0x1c0] sm:$0xff]   ;;  %v59_v11 = vpack.c.bf16 %v51_v9, %v51_v9  ;;  %v50_v13 = vld [vmem:[%s1676_s0 + $0x30] sm:$0xff] }
  0x24   :  { %1207 = vmatpush3.bf16.msra.mxu0 %v1398_v22  ;;  %v1438_v6 = vld [vmem:[#allocation2 + $0x100] sm:$0xff]   ;;  %v49_v8 = vld [vmem:[%s1676_s0 + $0x28] sm:$0xff]  ;;  %v58_v15 = vpack.c.bf16 %v50_v13, %v50_v13  ;;  %v1440_v16 = vld [vmem:[%s1678_s2 + $0x38] sm:$0xff]  }
  0x25   :  { %1229 = vmatpush3.bf16.msra.mxu1 %v1399_v23  ;;  %1208 = vmatprep.subr.bf16.mxu0 %v1400_v24  ;;  %v1439_v7 = vld [vmem:[#allocation2 + $0x180] sm:$0xff]   ;;  %v57_v10 = vpack.c.bf16 %v49_v8, %v49_v8  ;;  %v1441_v18 = vld [vmem:[%s1678_s2 + $0x30] sm:$0xff]   ;;  %v1442_v19 = vld [vmem:[%s1678_s2 + $0x28] sm:$0xff]  }
  0x26   :  { %1230 = vmatprep.subr.bf16.mxu1 %v1401_v25  ;;  %v48_v12 = vld [vmem:[%s1676_s0 + $0x20] sm:$0xff]  ;;  %v1444_v21 = vld [vmem:[%s1678_s2 + $0x18] sm:$0xff]   ;;  %v1445_v22 = vld [vmem:[%s1678_s2 + $0x10] sm:$0xff]  }
  0x27   :  { %v56_v14 = vpack.c.bf16 %v48_v12, %v48_v12  ;;  %v1443_v20 = vld [vmem:[%s1678_s2 + $0x20] sm:$0xff]   ;;  %v1446_v23 = vld [vmem:[%s1678_s2 + $0x8] sm:$0xff]   ;;  %v1448_v25 = vld [vmem:[%s1679_s3 + $0x38] sm:$0xff]  }
  0x28   :  { %1209 = vmatpush3.bf16.msra.mxu0 %v1402_v26  ;;  %v1447_v24 = vld [vmem:[%s1678_s2] sm:$0xff]   ;;  %v1449_v26 = vld [vmem:[%s1679_s3 + $0x30] sm:$0xff]  }
  0x29   :  { %1231 = vmatpush3.bf16.msra.mxu1 %v1403_v27  ;;  %1210 = vmatprep.subr.bf16.mxu0 %v1404_v28  ;;  %v1450_v27 = vld [vmem:[%s1679_s3 + $0x28] sm:$0xff]   ;;  %v1451_v28 = vld [vmem:[%s1679_s3 + $0x20] sm:$0xff]  }
  0x2a   :  { %1232 = vmatprep.subr.bf16.mxu1 %v1405_v29  ;;  %v1452_v29 = vld [vmem:[%s1679_s3 + $0x18] sm:$0xff]   ;;  %v1173_v12 = vld [vmem:[%s1681_s5 + $0x4] ss:$0 sm:$0xff] }
  0x2c   :  { %1211 = vmatpush3.bf16.msra.mxu0 %v1406_v30  ;;  %v1453_v30 = vld [vmem:[%s1679_s3 + $0x10] sm:$0xff]  }
  0x2d   :  { %1233 = vmatpush3.bf16.msra.mxu1 %v1407_v31  ;;  %1240 = vmatprep.subr.bf16.mxu0 %v1408_v40  ;;  %v1097_v40 = vld [vmem:[%s1681_s5] ss:$0 sm:$0xff] }
  0x2e   :  { %1262 = vmatprep.subr.bf16.mxu1 %v1409_v41 }
  0x2f   :  { %611 = vmatmul.mubr.bf16.vlgmr.msra.gmra.mxu0 %v52_v37 }
  0x30   :  { %651 = vmatmul.mubr.bf16.vlgmr.msra.gmra.mxu1 %v54_v39  ;;  %1241 = vmatpush3.bf16.msra.mxu0 %v1410_v42 }
  0x31   :  { %1263 = vmatpush3.bf16.msra.mxu1 %v1411_v43  ;;  %1242 = vmatprep.subr.bf16.mxu0 %v1412_v44 }
  0x32   :  { %1264 = vmatprep.subr.bf16.mxu1 %v1413_v45  ;;  %690 = vmatprep.mubr.bf16.mxu0 %v57_v10  ;;  %v1462_v10 = vld [vmem:[%s1680_s4 + $0x8] sm:$0xff]  }
  0x33   :  { %730 = vmatprep.mubr.bf16.mxu1 %v59_v11  ;;  %v1463_v11 = vld [vmem:[%s1680_s4] sm:$0xff]  }
  0x34   :  { %1243 = vmatpush3.bf16.msra.mxu0 %v1414_v46 }
  0x35   :  { %1265 = vmatpush3.bf16.msra.mxu1 %v1415_v47  ;;  %1244 = vmatprep.subr.bf16.mxu0 %v1416_v48 }
  0x36   :  { %1266 = vmatprep.subr.bf16.mxu1 %v1417_v49 }
  0x38   :  { %1245 = vmatpush3.bf16.msra.mxu0 %v1418_v50 }
  0x39   :  { %1267 = vmatpush3.bf16.msra.mxu1 %v1419_v51  ;;  %1246 = vmatprep.subr.bf16.mxu0 %v1420_v52 }
  0x3a   :  { %1268 = vmatprep.subr.bf16.mxu1 %v1421_v53 }
  0x3c   :  { %1247 = vmatpush3.bf16.msra.mxu0 %v1422_v54 }
  0x3d   :  { %1269 = vmatpush3.bf16.msra.mxu1 %v1423_v55  ;;  %1248 = vmatprep.subr.bf16.mxu0 %v1424_v56 }
  0x3e   :  { %1270 = vmatprep.subr.bf16.mxu1 %v1425_v57 }
  0x40   :  { %1249 = vmatpush3.bf16.msra.mxu0 %v1426_v58  ;;  %v1454_v58 = vld [vmem:[%s1679_s3 + $0x8] sm:$0xff]  }
  0x41   :  { %1271 = vmatpush3.bf16.msra.mxu1 %v1427_v59  ;;  %1250 = vmatprep.subr.bf16.mxu0 %v1428_v60  ;;  %v1455_v59 = vld [vmem:[%s1679_s3] sm:$0xff]   ;;  %v1456_v60 = vld [vmem:[%s1680_s4 + $0x38] sm:$0xff]  }
  0x42   :  { %1272 = vmatprep.subr.bf16.mxu1 %v1429_v61  ;;  %v1457_v61 = vld [vmem:[%s1680_s4 + $0x30] sm:$0xff]  }
  0x44   :  { %1251 = vmatpush3.bf16.msra.mxu0 %v1430_v62  ;;  %v1458_v62 = vld [vmem:[%s1680_s4 + $0x28] sm:$0xff]  }
  0x45   :  { %1273 = vmatpush3.bf16.msra.mxu1 %v1431_v63  ;;  %1252 = vmatprep.subr.bf16.mxu0 %v1432_v0  ;;  %v1459_v63 = vld [vmem:[%s1680_s4 + $0x20] sm:$0xff]   ;;  %v1460_v0 = vld [vmem:[%s1680_s4 + $0x18] sm:$0xff]  }
  0x46   :  { %1274 = vmatprep.subr.bf16.mxu1 %v1433_v1  ;;  %v1461_v1 = vld [vmem:[%s1680_s4 + $0x10] sm:$0xff]  }
  0x48   :  { %1253 = vmatpush3.bf16.msra.mxu0 %v1434_v2  ;;  %v1164_v2 = vld [vmem:[%s1681_s5 + $0x3] ss:$0 sm:$0xff] }
  0x49   :  { %1275 = vmatpush3.bf16.msra.mxu1 %v1435_v3  ;;  %1254 = vmatprep.subr.bf16.mxu0 %v1436_v4 }
  0x4a   :  { %1276 = vmatprep.subr.bf16.mxu1 %v1437_v5 }
  0x4c   :  { %1255 = vmatpush3.bf16.msra.mxu0 %v1438_v6 }
  0x4d   :  { %1277 = vmatpush3.bf16.msra.mxu1 %v1439_v7  ;;  %1311 = vmatprep.subr.bf16.mxu0 %v1489_v17 }
  0x4e   :  { %1331 = vmatprep.subr.bf16.mxu1 %v1489_v17 }
  0x4f   :  { %691 = vmatmul.mubr.bf16.vlgmr.msra.gmra.mxu0 %v56_v14 }
  0x50   :  { %731 = vmatmul.mubr.bf16.vlgmr.msra.gmra.mxu1 %v58_v15  ;;  %1312 = vmatpush3.bf16.msra.mxu0 %v1440_v16 }
  0x51   :  { %1313 = vmatprep.subr.bf16.mxu0 %v1489_v17  ;;  %1327 = vmatprep.mubr.msk.bf16.mxu0 %vm1490_vm0, %v1489_v17 }
  0x52   :  { %1347 = vmatprep.mubr.msk.bf16.mxu1 %vm1490_vm0, %v1489_v17  ;;  %1332 = vmatpush3.bf16.msra.mxu1 %v1448_v25 }
  0x53   :  { %1333 = vmatprep.subr.bf16.mxu1 %v1489_v17 }
  0x54   :  { %1314 = vmatpush3.bf16.msra.mxu0 %v1441_v18 }
  0x55   :  { %1315 = vmatprep.subr.bf16.mxu0 %v1489_v17 }
  0x56   :  { %1334 = vmatpush3.bf16.msra.mxu1 %v1449_v26 }
  0x57   :  { %1335 = vmatprep.subr.bf16.mxu1 %v1489_v17 }
  0x58   :  { %1316 = vmatpush3.bf16.msra.mxu0 %v1442_v19 }
  0x59   :  { %1317 = vmatprep.subr.bf16.mxu0 %v1489_v17 }
  0x5a   :  { %1336 = vmatpush3.bf16.msra.mxu1 %v1450_v27 }
  0x5b   :  { %1337 = vmatprep.subr.bf16.mxu1 %v1489_v17 }
  0x5c   :  { %1318 = vmatpush3.bf16.msra.mxu0 %v1443_v20 }
  0x5d   :  { %1319 = vmatprep.subr.bf16.mxu0 %v1489_v17 }
  0x5e   :  { %1338 = vmatpush3.bf16.msra.mxu1 %v1451_v28 }
  0x5f   :  { %1339 = vmatprep.subr.bf16.mxu1 %v1489_v17 }
  0x60   :  { %1320 = vmatpush3.bf16.msra.mxu0 %v1444_v21 }
  0x61   :  { %1321 = vmatprep.subr.bf16.mxu0 %v1489_v17 }
  0x62   :  { %1340 = vmatpush3.bf16.msra.mxu1 %v1452_v29 }
  0x63   :  { %1341 = vmatprep.subr.bf16.mxu1 %v1489_v17 }
  0x64   :  { %1322 = vmatpush3.bf16.msra.mxu0 %v1445_v22  ;;  %v1163_v22 = vld [vmem:[%s1681_s5 + $0x2] ss:$0 sm:$0xff] }
  0x65   :  { %1323 = vmatprep.subr.bf16.mxu0 %v1489_v17 }
  0x66   :  { %1342 = vmatpush3.bf16.msra.mxu1 %v1453_v30 }
  0x67   :  { %1343 = vmatprep.subr.bf16.mxu1 %v1489_v17 }
  0x68   :  { %1324 = vmatpush3.bf16.msra.mxu0 %v1446_v23  ;;  %v1182_v23 = vld [vmem:[%s1681_s5 + $0x5] ss:$0 sm:$0xff] }
  0x69   :  { %1325 = vmatprep.subr.bf16.mxu0 %v1489_v17 }
  0x6a   :  { %1344 = vmatpush3.bf16.msra.mxu1 %v1454_v58 }
  0x6b   :  { %1345 = vmatprep.subr.bf16.mxu1 %v1489_v17 }
  0x6c   :  { %1326 = vmatpush3.bf16.msra.mxu0 %v1447_v24 }
  0x6d   :  { %1351 = vmatprep.subr.bf16.mxu0 %v1489_v17 }
  0x6e   :  { %1346 = vmatpush3.bf16.msra.mxu1 %v1455_v59 }
  0xef   :  { %v1212_v31 = vpop.f32.mrf.mxu0 }
  0xf0   :  { %v1234_v32 = vpop.f32.mrf.mxu1 }
  0xf1   :  { %v1213_v33 = vpop.f32.mrf.mxu0 }
  0xf2   :  { %v1235_v34 = vpop.f32.mrf.mxu1  ;;  %v1214_v39 = vadd.f32 %v1213_v33, %v1212_v31 }
  0xf3   :  { %v1215_v35 = vpop.f32.mrf.mxu0  ;;  %v1236_v42 = vadd.f32 %v1235_v34, %v1234_v32 }
  0xf4   :  { %v1237_v36 = vpop.f32.mrf.mxu1  ;;  %v613_v41 = vadd.f32 %v1214_v39, %v1097_v40 }
  0xf5   :  { %v1216_v37 = vpop.f32.mrf.mxu0 }
  0xf6   :  { %v1238_v38 = vpop.f32.mrf.mxu1  ;;  %v653_v46 = vadd.f32 %v1236_v42, %v613_v41 }
 0x10f   :  { %v1256_v43 = vpop.f32.mrf.mxu0 }
 0x110   :  { %v1278_v44 = vpop.f32.mrf.mxu1 }
 0x111   :  { %v1257_v45 = vpop.f32.mrf.mxu0 }
 0x112   :  { %v1258_v47 = vadd.f32 %v1257_v45, %v1256_v43  ;;  %v1279_v48 = vpop.f32.mrf.mxu1 }
 0x113   :  { %v1259_v49 = vpop.f32.mrf.mxu0  ;;  %v1280_v51 = vadd.f32 %v1279_v48, %v1278_v44 }
 0x114   :  { %v693_v50 = vadd.f32 %v1258_v47, %v653_v46  ;;  %v1281_v52 = vpop.f32.mrf.mxu1 }
 0x115   :  { %v1260_v53 = vpop.f32.mrf.mxu0 }
 0x116   :  { %v733_v54 = vadd.f32 %v1280_v51, %v693_v50  ;;  %v1282_v55 = vpop.f32.mrf.mxu1 }
 0x118   :  { %v738_v56 = vmax.f32 %v733_v54, 0.0 }
 0x11a   :  { %v753_v57 = vpack.c.bf16 %v738_v56, %v738_v56 }
 0x11c   :  { %1328 = vmatmul.mubr.bf16.vlgmr.msra.gmra.mxu0 %v753_v57 }
 0x11d   :  { %1367 = vmatprep.mubr.msk.bf16.mxu0 %vm1490_vm0, %v1489_v17  ;;  %1352 = vmatpush3.bf16.msra.mxu0 %v1456_v60 }
 0x11e   :  { %1353 = vmatprep.subr.bf16.mxu0 %v1489_v17 }
 0x121   :  { %1354 = vmatpush3.bf16.msra.mxu0 %v1457_v61 }
 0x122   :  { %1355 = vmatprep.subr.bf16.mxu0 %v1489_v17 }
 0x125   :  { %1356 = vmatpush3.bf16.msra.mxu0 %v1458_v62 }
 0x126   :  { %1357 = vmatprep.subr.bf16.mxu0 %v1489_v17 }
 0x129   :  { %1358 = vmatpush3.bf16.msra.mxu0 %v1459_v63 }
 0x12a   :  { %1359 = vmatprep.subr.bf16.mxu0 %v1489_v17 }
 0x12d   :  { %1360 = vmatpush3.bf16.msra.mxu0 %v1460_v0 }
 0x12e   :  { %1361 = vmatprep.subr.bf16.mxu0 %v1489_v17 }
 0x131   :  { %1362 = vmatpush3.bf16.msra.mxu0 %v1461_v1 }
 0x132   :  { %1363 = vmatprep.subr.bf16.mxu0 %v1489_v17 }
 0x135   :  { %1364 = vmatpush3.bf16.msra.mxu0 %v1462_v10 }
 0x136   :  { %1365 = vmatprep.subr.bf16.mxu0 %v1489_v17  ;;  %v1162_v17 = vld [vmem:[%s1681_s5 + $0x1] ss:$0 sm:$0xff] }
 0x137   :  { %v745_v21 = vmul.f32 %v1162_v17, %v738_v56 }
 0x139   :  { %1366 = vmatpush3.bf16.msra.mxu0 %v1463_v11  ;;  %v752_v25 = vadd.f32 %v1163_v22, %v745_v21 }
 0x1dc   :  { %v858_v3 = vpop.f32.mrf.mxu0 }
 0x1dd   :  { %v859_v4 = vadd.f32 %v1164_v2, %v858_v3 }
 0x1de   :  { %v1329_v5 = vpop.f32.mrf.mxu0 }
 0x1df   :  { %v864_v6 = vmax.f32 %v859_v4, 0.0 }
 0x1e0   :  { %v861_v7 = vpop.f32.mrf.mxu0 }
 0x1e1   :  { %v865_v8 = vpack.c.bf16 %v864_v6, %v864_v6 }
 0x1e2   :  { %v1330_v9 = vpop.f32.mrf.mxu0 }
 0x1e3   :  { %1348 = vmatmul.mubr.bf16.vlgmr.msra.gmra.mxu1 %v865_v8 }
 0x2a3   :  { %v970_v13 = vpop.f32.mrf.mxu1 }
 0x2a4   :  { %v971_v14 = vadd.f32 %v1173_v12, %v970_v13 }
 0x2a5   :  { %v1349_v15 = vpop.f32.mrf.mxu1 }
 0x2a6   :  { %v976_v16 = vmax.f32 %v971_v14, 0.0 }
 0x2a7   :  { %v973_v18 = vpop.f32.mrf.mxu1 }
 0x2a8   :  { %v977_v19 = vpack.c.bf16 %v976_v16, %v976_v16 }
 0x2a9   :  { %v1350_v20 = vpop.f32.mrf.mxu1 }
 0x2aa   :  { %1368 = vmatmul.mubr.bf16.vlgmr.msra.gmra.mxu0 %v977_v19 }
 0x36a   :  { %v1082_v24 = vpop.f32.mrf.mxu0 }
 0x36b   :  { %v1083_v26 = vadd.f32 %v1182_v23, %v1082_v24 }
 0x36c   :  { %v1369_v27 = vpop.f32.mrf.mxu0 }
 0x36d   :  { %v1194_v28 = vpack.c.bf16 %v752_v25, %v1083_v26 }
 0x36e   :  { %v1085_v29 = vpop.f32.mrf.mxu0 }
 0x36f   :  { %1195 = vst [vmem:[%s1682_s6] sm:$0xff] %v1194_v28  }
 0x370   :  { %v1370_v30 = vpop.f32.mrf.mxu0 }
 0x371   :  { %1096 = vsyncpa [#allocation3], 1 }

</bundles_post_ra>
